<compile_context>
chip_gen: v6e
topology: v6e:2x2x1
jax: 0.10.0
libtpu: 0.0.40
codegen_flags: <defaults>
</compile_context>

<pallas_src>
import jax
import jax.numpy as jnp
from jax.experimental import pallas as pl
from jax.experimental.pallas import tpu as pltpu


# ---------------------------------------------------------------------------
# Stage 1: sanitize + L2-normalize rows (scale folded in for the image side).
# Output is bfloat16 to halve stage-2 memory traffic; math stays f32.
# ---------------------------------------------------------------------------
def _normalize_kernel(fold_ref, x_ref, out_ref):
    x = x_ref[...].astype(jnp.float32)
    # torch.nan_to_num(x, nan=0.0, posinf=1.0, neginf=-1.0); identity on finite
    # inputs, so applying unconditionally is equivalent to the torch guard.
    x = jnp.nan_to_num(x, nan=0.0, posinf=1.0, neginf=-1.0)
    # F.normalize(x, dim=1): x / clamp(||x||_2, min=1e-12); a single per-row
    # reciprocal (folded with the scale) then one multiply per element.
    ss = jnp.sum(x * x, axis=1, keepdims=True)
    inv = fold_ref[0] / jnp.maximum(jnp.sqrt(ss), jnp.float32(1e-12))
    out_ref[...] = (x * inv).astype(out_ref.dtype)


# ---------------------------------------------------------------------------
# Stage 2: tiled logits + softplus loss with lane-dense scratch accumulation.
# ---------------------------------------------------------------------------
def _siglip_tile_kernel(bias_ref, img_ref, txt_ref, out_ref, acc_ref):
    i = pl.program_id(0)
    j = pl.program_id(1)
    tm = img_ref.shape[0]
    tn = txt_ref.shape[0]
    lanes = acc_ref.shape[1]       # 128 when TN is a multiple of 128, else TN
    nchunk = tn // lanes

    @pl.when(j == 0)
    def _init():
        acc_ref[...] = jnp.zeros_like(acc_ref)

    # logits = (img_n * scale) @ txt_n^T + bias  -- contract the shared last
    # axis directly so no transpose of the text tile is materialized.  bf16
    # operands, f32 accumulation on the MXU.
    logits = jax.lax.dot_general(
        img_ref[...], txt_ref[...],
        dimension_numbers=(((1,), (1,)), ((), ())),
        preferred_element_type=jnp.float32,
    ) + bias_ref[0]
    # NOTE: logits are provably finite here (embeds sanitized, scale clamped);
    # the reference's conditional nan_to_num(logits) is skipped on this path and
    # the pathological non-finite-bias case is covered by the final loss guard.

    # Off-diagonal labels are -1 -> softplus(+logits) everywhere; numerically
    # stable form: max(z, 0) + log1p(exp(-|z|)).
    sp = jnp.maximum(logits, 0.0) + jnp.log1p(jnp.exp(-jnp.abs(logits)))

    # Fold the (TM, TN) softplus tile down to (TM, lanes) with full-vreg VPU
    # adds only (static 128-lane slices are vreg-aligned views) and accumulate
    # into the lane-dense scratch -- no cross-lane XLU reduce, no masked
    # narrow store in the hot loop.
    acc = acc_ref[...]
    for k in range(nchunk):
        acc = acc + sp[:, k * lanes:(k + 1) * lanes]
    acc_ref[...] = acc

    # Diagonal labels are +1: softplus(-x) = softplus(x) - x, so subtract the
    # diagonal logits.  Only tiles whose global row/col ranges overlap can
    # contain diagonal elements; gate the (VPU-only) correction on that.
    row0 = i * tm
    col0 = j * tn
    has_diag = jnp.logical_and(row0 < col0 + tn, col0 < row0 + tm)

    @pl.when(has_diag)
    def _diag():
        r = jax.lax.broadcasted_iota(jnp.int32, logits.shape, 0) + row0
        c = jax.lax.broadcasted_iota(jnp.int32, logits.shape, 1) + col0
        d = jnp.where(r == c, logits, 0.0)
        a = acc_ref[...]
        for k in range(nchunk):
            a = a - d[:, k * lanes:(k + 1) * lanes]
        acc_ref[...] = a

    # Single cross-lane reduce + narrow (TM, 1) store, outside the hot loop.
    @pl.when(j == pl.num_programs(1) - 1)
    def _finalize():
        out_ref[...] = jnp.sum(acc_ref[...], axis=1, keepdims=True)


def _pick_tiles(b):
    """Return (TM, TN): image row tile (large, reduces text re-streaming) and
    text column tile (MXU-native 256/128)."""
    def largest_divisor(cands):
        for c in cands:
            if b % c == 0:
                return c
        return None

    tm = largest_divisor((512, 256, 128, 64, 32, 16, 8))
    tn = largest_divisor((256, 128, 64, 32, 16, 8))
    if tm is None or tn is None:
        # TODO(synk): ragged B (not a multiple of 8) falls back to a single
        # whole-rows block; a masked tail tile would be needed for huge odd B.
        return b, b
    # Keep >= 2 row tiles when possible so the "parallel" i axis still splits
    # across both TensorCores on v7x.
    while tm > 8 and b // tm < 2 and b % (tm // 2) == 0:
        tm //= 2
    return tm, tn


def siglip_contrastive_loss(image_embeds, text_embeds, logit_scale, logit_bias):
    """image_embeds, text_embeds: [B, D]. logit_scale / logit_bias: scalars."""
    B, D = image_embeds.shape

    # Pad the embedding dim to a 128-lane multiple with zeros (does not change
    # row norms or dot products) so every vreg lane and the MXU K dim are fed.
    Dp = ((D + 127) // 128) * 128
    if Dp != D:
        image_embeds = jnp.pad(image_embeds, ((0, 0), (0, Dp - D)))
        text_embeds = jnp.pad(text_embeds, ((0, 0), (0, Dp - D)))

    TM, TN = _pick_tiles(B)
    grid_i = B // TM
    grid_j = B // TN
    LANES = 128 if TN % 128 == 0 else TN   # lane-dense scratch width

    scale = jnp.clip(jnp.asarray(logit_scale, jnp.float32), 0.01, 100.0).reshape(1)
    one = jnp.ones((1,), jnp.float32)
    bias = jnp.asarray(logit_bias, jnp.float32).reshape(1)

    def normalize(x, fold):
        return pl.pallas_call(
            _normalize_kernel,
            out_shape=jax.ShapeDtypeStruct((B, Dp), jnp.bfloat16),
            grid=(grid_i,),
            in_specs=[
                pl.BlockSpec(memory_space=pltpu.SMEM),            # fold factor
                pl.BlockSpec((TM, Dp), lambda i: (i, 0)),         # rows
            ],
            out_specs=pl.BlockSpec((TM, Dp), lambda i: (i, 0)),
            compiler_params=pltpu.CompilerParams(
                dimension_semantics=("parallel",)),
        )(fold, x)

    img_n = normalize(image_embeds, scale)   # clamped scale folded in, bf16
    txt_n = normalize(text_embeds, one)      # bf16

    # Stage-2 traffic: img read once per row tile, txt re-streamed grid_i times.
    cost = pl.CostEstimate(
        flops=2 * B * B * Dp,
        transcendentals=2 * B * B,
        bytes_accessed=(B * Dp + grid_i * B * Dp) * 2 + 4 * B,
    )

    partial = pl.pallas_call(
        _siglip_tile_kernel,
        out_shape=jax.ShapeDtypeStruct((B, 1), jnp.float32),
        grid=(grid_i, grid_j),
        in_specs=[
            pl.BlockSpec(memory_space=pltpu.SMEM),                # logit_bias
            pl.BlockSpec((TM, Dp), lambda i, j: (i, 0)),          # image rows
            pl.BlockSpec((TN, Dp), lambda i, j: (j, 0)),          # text rows
            # NOTE: if xprof shows exposed DMA on the text operand, add
            # pipeline_mode=pl.Buffered(3) to the txt spec (costs one extra
            # TN x Dp VMEM buffer -- matters on v7x's 64 MiB).
        ],
        out_specs=pl.BlockSpec((TM, 1), lambda i, j: (i, 0)),     # per-row sums
        scratch_shapes=[pltpu.VMEM((TM, LANES), jnp.float32)],    # lane-dense acc
        compiler_params=pltpu.CompilerParams(
            dimension_semantics=("parallel", "arbitrary"),
            # Working set is a few MiB; 56 MiB stays inside v7x's 64 MiB
            # physical VMEM while giving ample headroom on v5e/v6e (128 MiB).
            vmem_limit_bytes=56 * 1024 * 1024,
        ),
        cost_estimate=cost,
    )(bias, img_n, txt_n)

    loss = jnp.sum(partial) / jnp.float32(B * B)
    # Mirrors the torch.isfinite(loss) dummy-loss fallback.
    loss = jnp.where(jnp.isfinite(loss), loss, jnp.float32(1.0))
    return loss


def _reference_loss(image_embeds, text_embeds, logit_scale, logit_bias):
    """Pure-JAX reference of the PyTorch forward, for a sanity check."""
    img = jnp.nan_to_num(image_embeds.astype(jnp.float32), nan=0.0, posinf=1.0, neginf=-1.0)
    txt = jnp.nan_to_num(text_embeds.astype(jnp.float32), nan=0.0, posinf=1.0, neginf=-1.0)
    img = img / jnp.maximum(jnp.linalg.norm(img, axis=1, keepdims=True), 1e-12)
    txt = txt / jnp.maximum(jnp.linalg.norm(txt, axis=1, keepdims=True), 1e-12)
    scale = jnp.clip(jnp.float32(logit_scale), 0.01, 100.0)
    logits = img @ txt.T * scale + jnp.float32(logit_bias)
    logits = jnp.nan_to_num(logits, nan=0.0, posinf=10.0, neginf=-10.0)
    B = img.shape[0]
    labels = 2.0 * jnp.eye(B, dtype=jnp.float32) - 1.0
    return jnp.mean(jax.nn.softplus(-(labels * logits)))


if __name__ == "__main__":
    # Deterministic parameter init per the module __init__.
    init_logit_scale = 10.0
    init_logit_bias = -10.0

    B, D = 8, 32  # small shapes: batch=8, embed hidden=32
    key = jax.random.PRNGKey(0)
    k_img, k_txt = jax.random.split(key)
    image_embeds = jax.random.normal(k_img, (B, D), dtype=jnp.float32)
    text_embeds = jax.random.normal(k_txt, (B, D), dtype=jnp.float32)

    loss = siglip_contrastive_loss(image_embeds, text_embeds,
                                   init_logit_scale, init_logit_bias)
    loss = jax.block_until_ready(loss)

    ref = _reference_loss(image_embeds, text_embeds,
                          init_logit_scale, init_logit_bias)
    assert jnp.isfinite(loss), "loss is not finite"
    # bf16 normalized embeddings (f32 accumulation) -> slightly looser tolerance.
    assert jnp.allclose(loss, ref, rtol=2e-2, atol=2e-2), (loss, ref)
    print("KERNEL_OK")
</pallas_src>

<mosaic_0001>
module attributes {stable_mosaic.version = 11 : i64} {
  func.func @_normalize_kernel(%arg0: i32, %arg1: memref<1xf32, #tpu.memory_space<smem>>, %arg2: memref<8x128xf32, #tpu.memory_space<vmem>>, %arg3: memref<8x128xbf16, #tpu.memory_space<vmem>>) attributes {dimension_semantics = [#tpu.dimension_semantics<parallel>], iteration_bounds = array<i64: 1>, scalar_prefetch = 0 : i64, scratch_operands = 0 : i64, tpu.core_type = #tpu.core_type<tc>, window_params = [{transform_indices = @transform_0, window_bounds = array<i64: 1>}, {transform_indices = @transform_1, window_bounds = array<i64: 8, 128>}, {transform_indices = @transform_2, window_bounds = array<i64: 8, 128>}]} {
    %c0 = arith.constant 0 : index
    %c0_0 = arith.constant 0 : index
    %0 = vector.load %arg2[%c0, %c0_0] : memref<8x128xf32, #tpu.memory_space<vmem>>, vector<8x128xf32>
    %cst = arith.constant 0.000000e+00 : f32
    %cst_1 = arith.constant -1.000000e+00 : f32
    %cst_2 = arith.constant 1.000000e+00 : f32
    %1 = arith.cmpf one, %0, %0 : vector<8x128xf32>
    %2 = vector.broadcast %cst : f32 to vector<8x128xf32>
    %3 = arith.select %1, %2, %0 : vector<8x128xi1>, vector<8x128xf32>
    %cst_3 = arith.constant 0x7F800000 : f32
    %4 = vector.broadcast %cst_3 : f32 to vector<8x128xf32>
    %5 = arith.cmpf oeq, %3, %4 : vector<8x128xf32>
    %6 = vector.broadcast %cst_2 : f32 to vector<8x128xf32>
    %7 = arith.select %5, %6, %3 : vector<8x128xi1>, vector<8x128xf32>
    %cst_4 = arith.constant 0xFF800000 : f32
    %8 = vector.broadcast %cst_4 : f32 to vector<8x128xf32>
    %9 = arith.cmpf oeq, %7, %8 : vector<8x128xf32>
    %10 = vector.broadcast %cst_1 : f32 to vector<8x128xf32>
    %11 = arith.select %9, %10, %7 : vector<8x128xi1>, vector<8x128xf32>
    %12 = arith.mulf %11, %11 : vector<8x128xf32>
    %cst_5 = arith.constant dense<0.000000e+00> : vector<8xf32>
    %13 = vector.multi_reduction <add>, %12, %cst_5 [1] : vector<8x128xf32> to vector<8xf32>
    %14 = vector.shape_cast %13 : vector<8xf32> to vector<8x1xf32>
    %c0_6 = arith.constant 0 : index
    %15 = memref.load %arg1[%c0_6] : memref<1xf32, #tpu.memory_space<smem>>
    %16 = math.sqrt %14 : vector<8x1xf32>
    %cst_7 = arith.constant 9.99999996E-13 : f32
    %17 = vector.broadcast %cst_7 : f32 to vector<8x1xf32>
    %18 = arith.maximumf %16, %17 : vector<8x1xf32>
    %19 = vector.broadcast %15 : f32 to vector<8x1xf32>
    %20 = arith.divf %19, %18 : vector<8x1xf32>
    %21 = vector.broadcast %20 : vector<8x1xf32> to vector<8x128xf32>
    %22 = arith.mulf %11, %21 : vector<8x128xf32>
    %23 = arith.truncf %22 : vector<8x128xf32> to vector<8x128xbf16>
    %c0_8 = arith.constant 0 : index
    %c0_9 = arith.constant 0 : index
    %24 = vector.load %arg3[%c0_8, %c0_9] : memref<8x128xbf16, #tpu.memory_space<vmem>>, vector<8x128xbf16>
    tpu.vector_store %arg3[%c0_8, %c0_9], %23 {strides = array<i32>} : memref<8x128xbf16, #tpu.memory_space<vmem>>, vector<8x128xbf16>,
    return
  }
  func.func @transform_0(%arg0: i32) -> i32 {
    %c0_i32 = arith.constant 0 : i32
    %c0_i32_0 = arith.constant 0 : i32
    return %c0_i32 : i32
  }
  func.func @transform_1(%arg0: i32) -> (i32, i32) {
    %c0_i32 = arith.constant 0 : i32
    %c0_i32_0 = arith.constant 0 : i32
    return %arg0, %c0_i32 : i32, i32
  }
  func.func @transform_2(%arg0: i32) -> (i32, i32) {
    %c0_i32 = arith.constant 0 : i32
    %c0_i32_0 = arith.constant 0 : i32
    return %arg0, %c0_i32 : i32, i32
  }
}

</mosaic_0001>

<bundles_post_ra>
// kernel: tpu_custom_call.1
= control target key start
LH: loop header
LB: loop body
LE: loop exit
PB: predicated region body
PF: predicated region fallthrough
CT: control target
= control target key end

     0   :  { %8 = vsyncpa [#allocation4], 0  ;;  %s141_s0 = inlined_call_operand.<no memory space> [shape: f32[1], index: 0, kind: input, shape index: {}]   ;;  %s142_s1 = inlined_call_operand.hbm [shape: f32[8,128], index: 1, kind: input, shape index: {}]   ;;  %s143_s2 = inlined_call_operand.hbm [shape: bf16[8,128], index: 2, kind: output, shape index: {}]  }
   0x1   :  { %9 = vsyncpa [#allocation5], 0  ;;  %s115_s9 = smov [#allocation3]  }
   0x2   :  { %s18_s10 = sshll.u32 %s115_s9, 4  ;;  %s19_s10 = int_to_ptr.vmem [resolvable:$true] %s18_s10 }
   0x3   :  { %s79_s11 = scalar_lea.vmem %s19_s10, 128  ;;  %p84_p1 = scmp.lt.s32.totalorder %s19_s10, %s19_s10 }
   0x4   :  { %p80_p0 = scmp.ne.s32.totalorder %s19_s10, %s79_s11  ;;  %p85_p2 = scmp.lt.s32.totalorder %s79_s11, %s79_s11 }
   0x6   :  { %p86_p3 = por %p85_p2, %p84_p1 }
   0x8   :  { %p87_p4 = pnand %p86_p3, %p80_p0 }
   0xa   :  { %90 = shalt.err (!%p87_p4)
}
   0xb   :  { %21 = dma.hbm_to_vmem [thread:$0]  %s142_s1, 128, %s19_s10, [#allocation4]  }
   0xc   :  { %111 = dma.done.wait [#allocation4], 128  }
   0xd   :  { %112 = vsyncadd [#allocation4], 4294967168  ;;  %v25_v0 = vld [vmem:[#allocation3] sm:$0xff]  ;;  %v44_v12 = vstv %s141_s0  ;;  %s116_s15 = smov [#allocation6]  }
   0xe   :  { %vm26_vm0 = vcmp.ne.f32.partialorder %v25_v0, %v25_v0  ;;  %s56_s16 = sshll.u32 %s116_s15, 4  ;;  %s57_s16 = int_to_ptr.vmem [resolvable:$true] %s56_s16 }
   0xf   :  { %v27_v1 = vsel %vm26_vm0, 0.0, %v25_v0  ;;  %s91_s17 = scalar_lea.vmem %s57_s16, 64  ;;  %p96_p6 = scmp.lt.s32.totalorder %s57_s16, %s57_s16 }
  0x10   :  { %vm28_vm1 = vcmp.eq.f32.partialorder %v27_v1, inf  ;;  %p92_p5 = scmp.ne.s32.totalorder %s57_s16, %s91_s17  ;;  %p97_p7 = scmp.lt.s32.totalorder %s91_s17, %s91_s17 }
  0x11   :  { %v29_v2 = vsel %vm28_vm1, 1.0, %v27_v1 }
  0x12   :  { %vm30_vm2 = vcmp.eq.f32.partialorder %v29_v2, -inf  ;;  %p98_p8 = por %p97_p7, %p96_p6 }
  0x13   :  { %v31_v3 = vsel %vm30_vm2, -1.0, %v29_v2 }
  0x14   :  { %v32_v4 = vmul.f32 %v31_v3, %v31_v3  ;;  %p99_p9 = pnand %p98_p8, %p92_p5 }
  0x16   :  { %33 = vadd.xlane.f32.xlu0 %v32_v4 }
  0x9f   :  { %v34_v5 = vpop.xlane.xlu0 %33 }
  0xa0   :  { %67 = vrsqrt.f32 %v34_v5  ;;  %vm38_vm3 = vcmp.eq.f32.partialorder %v34_v5, inf  ;;  %v41_v8 = vand.u32 2147483648, %v34_v5  ;;  %vm40_vm4 = vcmp.eq.f32.partialorder %v34_v5, 0.0 }
  0xad   :  { %v68_v6 = vpop.eup %67 }
  0xae   :  { %v37_v7 = vmul.f32 %v68_v6, %v34_v5 }
  0xb0   :  { %v39_v9 = vsel %vm38_vm3, %v34_v5, %v37_v7 }
  0xb1   :  { %v42_v10 = vsel %vm40_vm4, %v41_v8, %v39_v9 }
  0xb2   :  { %v43_v11 = vmax.f32 %v42_v10, 1e-12 }
  0xb4   :  { %69 = vrcp.f32 %v43_v11 }
  0xc1   :  { %v70_v13 = vpop.eup %69 }
  0xc2   :  { %v46_v14 = vmul.f32 %v70_v13, %v44_v12 }
  0xc4   :  { %v47_v15 = vmul.f32 %v46_v14, %v31_v3 }
  0xc6   :  { %v48_v16 = vpack.c.bf16 %v47_v15, %v47_v15 }
  0xc8   :  { %49 = vst [vmem:[#allocation6] sm:$0xf] %v48_v16 }
  0xc9   :  { %102 = shalt.err (!%p99_p9)
}
  0xca   :  { %59 = dma.vmem_to_hbm [thread:$0]  %s57_s16, 64, %s143_s2, [#allocation5]  }
  0xcb   :  { %113 = dma.done.wait [#allocation5], 64  }
  0xcc   :  { %114 = vsyncadd [#allocation5], 4294967232 }
  0xcd   :  { %63 = vsyncpa [#allocation4], 1 }
  0xce   :  { %64 = vsyncpa [#allocation5], 1 }

</bundles_post_ra>
